<compile_context>
chip_gen: v7x
topology: tpu7x:2x2x1
jax: 0.10.0
libtpu: 0.0.40
codegen_flags: <defaults>
</compile_context>

<pallas_src>
import functools

import jax
import jax.numpy as jnp
from jax import lax
from jax.experimental import pallas as pl
from jax.experimental.pallas import tpu as pltpu


def _round_up(x, m):
    return ((x + m - 1) // m) * m


def _cdiv(a, b):
    return -(-a // b)


def _invariant_spec(shape):
    """BlockSpec for a grid-invariant input: same block every step -> 1 buffer suffices."""
    idx_map = lambda i: (0,) * len(shape)
    if hasattr(pl, "Buffered"):
        try:
            return pl.BlockSpec(shape, idx_map, pipeline_mode=pl.Buffered(1))
        except TypeError:  # older jax without pipeline_mode kwarg
            pass
    return pl.BlockSpec(shape, idx_map)


def _sdpa_weight_kernel(*refs, scale, use_bias, use_mask):
    wq_ref, wk_ref, wv_ref = refs[0], refs[1], refs[2]
    idx = 3
    bias_ref = None
    mask_ref = None
    if use_bias:
        bias_ref = refs[idx]
        idx += 1
    if use_mask:
        mask_ref = refs[idx]
        idx += 1
    o_ref = refs[idx]

    # Q @ K^T on the MXU: bf16 operands, f32 accumulation, contracting the last dims of
    # both so no XLU transpose of Wk is materialized.
    qk = lax.dot_general(
        wq_ref[...], wk_ref[...],
        dimension_numbers=(((1,), (1,)), ((), ())),
        preferred_element_type=jnp.float32)

    if scale != 1.0:                       # trace-time constant
        qk = qk * jnp.float32(scale)

    if use_bias:
        # Precomputed (1, Dp) additive row: 0 for valid key columns, -1e30 for lane padding.
        qk = qk + bias_ref[...]

    # Numerically stable softmax; reciprocal goes to the (otherwise idle) EUP slot.
    m = jnp.max(qk, axis=-1, keepdims=True)
    e = jnp.exp(qk - m)
    denom = jnp.sum(e, axis=-1, keepdims=True)
    soft = e * pl.reciprocal(denom, approx=True)

    if use_mask:
        # Inverted-dropout mask, pre-scaled to {0, 1/keep_prob}, generated host-side.
        soft = soft * mask_ref[...]

    # (dropout(softmax(Q K^T * s))) @ V on the MXU, bf16 operands / f32 accumulation.
    o_ref[...] = jnp.dot(soft.astype(jnp.bfloat16), wv_ref[...],
                         preferred_element_type=jnp.float32).astype(o_ref.dtype)


def sdpa_weight_pattern(wq, wk, wv, *, scale_factor=1.0, dropout_p=1.0, dropout_key=None):
    """Pallas implementation of Model.forward. The PyTorch forward ignores its
    query/key/value arguments and only uses the in_proj weight slices wq, wk, wv."""
    D = wq.shape[0]
    out_dtype = jnp.float32

    # Module default p = 1: F.dropout(training=True) zeroes everything -> constant output,
    # no padding / DMA / kernel launch needed.
    if float(dropout_p) >= 1.0:
        return jnp.zeros((D, D), dtype=out_dtype)

    dropout_p = float(dropout_p)
    keep_prob = 1.0 - dropout_p
    use_mask = dropout_p > 0.0

    # ---- padded / tiled shapes ------------------------------------------------------
    Dp = _round_up(D, 128)          # lane dims (contraction, keys, Wv cols): 128-aligned
    Mp8 = _round_up(D, 8)           # output/Wq rows only need sublane alignment
    n_chunks = _cdiv(Mp8, 512)      # keep row tiles <= ~512 (amortize per-step overhead)
    if Mp8 >= 256:
        n_chunks = max(n_chunks, 2)  # >=2 row blocks so v7x's 2nd TensorCore gets work
    if n_chunks > 1:
        tm = _round_up(_cdiv(Mp8, n_chunks), 16)   # 16: bf16 sublane packing granule
    else:
        tm = Mp8
    Mp = tm * n_chunks

    use_bias = Dp > D               # padded key columns must be masked in the softmax

    # bf16 operands for the MXU (f32 accumulation inside the kernel); zero padding in the
    # contraction dim is exact, padded key rows of Wv are zero.
    wq_p = jnp.pad(wq, ((0, Mp - D), (0, Dp - D))).astype(jnp.bfloat16)
    wk_p = jnp.pad(wk, ((0, Dp - D), (0, Dp - D))).astype(jnp.bfloat16)
    wv_p = jnp.pad(wv, ((0, Dp - D), (0, Dp - D))).astype(jnp.bfloat16)

    operands = [wq_p, wk_p, wv_p]
    in_specs = [
        pl.BlockSpec((tm, Dp), lambda i: (i, 0)),   # Wq row tile (double-buffered)
        _invariant_spec((Dp, Dp)),                  # Wk, full, grid-invariant, 1 buffer
        _invariant_spec((Dp, Dp)),                  # Wv, full, grid-invariant, 1 buffer
    ]

    if use_bias:
        bias = jnp.where(jnp.arange(Dp) < D, 0.0, -1e30).astype(jnp.float32)[None, :]
        operands.append(bias)
        in_specs.append(_invariant_spec((1, Dp)))

    if use_mask:
        # TODO(synk): PyTorch's exact dropout RNG stream cannot be reproduced; an equivalent
        # Bernoulli keep-mask (pre-scaled by 1/keep_prob) is generated with jax.random.
        if dropout_key is None:
            dropout_key = jax.random.PRNGKey(0)
        keep = jax.random.bernoulli(dropout_key, p=keep_prob, shape=(Mp, Dp))
        mask = keep.astype(jnp.float32) * jnp.float32(1.0 / keep_prob)
        operands.append(mask)
        in_specs.append(pl.BlockSpec((tm, Dp), lambda i: (i, 0)))

    kernel = functools.partial(_sdpa_weight_kernel,
                               scale=float(scale_factor),
                               use_bias=use_bias,
                               use_mask=use_mask)

    # VMEM budget: double-buffered row-varying blocks + single-buffered invariants.
    wkv_bufs = 1 if hasattr(pl, "Buffered") else 2
    vmem_need = (2 * tm * Dp * 2                      # Wq tile, bf16, x2 buffers
                 + 2 * tm * Dp * 4                    # output tile, f32, x2 buffers
                 + (2 * tm * Dp * 4 if use_mask else 0)
                 + wkv_bufs * 2 * Dp * Dp * 2         # Wk + Wv, bf16
                 + (wkv_bufs * Dp * 4 if use_bias else 0))
    vmem_limit = int(min(max(vmem_need * 5 // 4 + (2 << 20), 16 << 20), 100 << 20))

    out_p = pl.pallas_call(
        kernel,
        out_shape=jax.ShapeDtypeStruct((Mp, Dp), out_dtype),
        grid=(Mp // tm,),
        in_specs=in_specs,
        out_specs=pl.BlockSpec((tm, Dp), lambda i: (i, 0)),
        compiler_params=pltpu.CompilerParams(
            dimension_semantics=("parallel",),        # row tiles shard across v7x's 2 TCs
            vmem_limit_bytes=vmem_limit),
    )(*operands)

    return out_p[:D, :D]


if __name__ == "__main__":
    D = 32                      # embed_dim (num_heads = 1)
    root = jax.random.PRNGKey(0)
    k_w, k_q, k_k, k_v, k_drop = jax.random.split(root, 5)

    # Deterministic stand-in for MultiheadAttention.in_proj_weight viewed as [Wq, Wk, Wv].
    in_proj_weight = jax.random.normal(k_w, (3, D, D), dtype=jnp.float32)
    wq, wk, wv = in_proj_weight[0], in_proj_weight[1], in_proj_weight[2]

    # Forward args (ignored by the PyTorch forward, kept only for interface parity).
    query = jax.random.normal(k_q, (1, 1, D), dtype=jnp.float32)
    key_in = jax.random.normal(k_k, (1, 1, D), dtype=jnp.float32)
    value = jax.random.normal(k_v, (1, 1, D), dtype=jnp.float32)
    del query, key_in, value

    # Module default: dropout_p = 1 -> output must be exactly zero (wrapper early exit).
    out = jax.block_until_ready(
        sdpa_weight_pattern(wq, wk, wv, scale_factor=1.0, dropout_p=1.0))
    assert out.shape == (D, D)
    assert bool(jnp.all(out == 0.0)), "dropout with p=1 must zero the output"

    # Hot compute path with dropout disabled, vs a reference using the same bf16 operand cast.
    out_nodrop = jax.block_until_ready(
        sdpa_weight_pattern(wq, wk, wv, scale_factor=1.0, dropout_p=0.0))
    wq_b = wq.astype(jnp.bfloat16).astype(jnp.float32)
    wk_b = wk.astype(jnp.bfloat16).astype(jnp.float32)
    wv_b = wv.astype(jnp.bfloat16).astype(jnp.float32)
    soft_ref = jax.nn.softmax(wq_b @ wk_b.T, axis=-1)
    ref = soft_ref.astype(jnp.bfloat16).astype(jnp.float32) @ wv_b
    err = float(jnp.max(jnp.abs(out_nodrop - ref)))
    assert jnp.allclose(out_nodrop, ref, atol=5e-3, rtol=5e-3), f"max abs err {err}"

    # Exercise the 0 < p < 1 dropout path (mask generated host-side with jax.random).
    out_drop = jax.block_until_ready(
        sdpa_weight_pattern(wq, wk, wv, scale_factor=1.0, dropout_p=0.5,
                            dropout_key=k_drop))
    assert out_drop.shape == (D, D)
    assert bool(jnp.all(jnp.isfinite(out_drop)))

    print("KERNEL_OK")
</pallas_src>

<mosaic_0001>
module attributes {stable_mosaic.version = 11 : i64} {
  func.func @_sdpa_weight_kernel(%arg0: i32, %arg1: memref<32x128xbf16, #tpu.memory_space<vmem>>, %arg2: memref<128x128xbf16, #tpu.memory_space<vmem>>, %arg3: memref<128x128xbf16, #tpu.memory_space<vmem>>, %arg4: memref<1x128xf32, #tpu.memory_space<vmem>>, %arg5: memref<32x128xf32, #tpu.memory_space<vmem>>) attributes {dimension_semantics = [#tpu.dimension_semantics<parallel>], iteration_bounds = array<i64: 1>, scalar_prefetch = 0 : i64, scratch_operands = 0 : i64, tpu.core_type = #tpu.core_type<tc>, window_params = [{transform_indices = @transform_0, window_bounds = array<i64: 32, 128>}, {pipeline_mode = #tpu.pipeline_mode<synchronous>, transform_indices = @transform_1, window_bounds = array<i64: 128, 128>}, {pipeline_mode = #tpu.pipeline_mode<synchronous>, transform_indices = @transform_2, window_bounds = array<i64: 128, 128>}, {pipeline_mode = #tpu.pipeline_mode<synchronous>, transform_indices = @transform_3, window_bounds = array<i64: 1, 128>}, {transform_indices = @transform_4, window_bounds = array<i64: 32, 128>}]} {
    %c0 = arith.constant 0 : index
    %c0_0 = arith.constant 0 : index
    %0 = vector.load %arg1[%c0, %c0_0] : memref<32x128xbf16, #tpu.memory_space<vmem>>, vector<32x128xbf16>
    %c0_1 = arith.constant 0 : index
    %c0_2 = arith.constant 0 : index
    %1 = vector.load %arg2[%c0_1, %c0_2] : memref<128x128xbf16, #tpu.memory_space<vmem>>, vector<128x128xbf16>
    %cst = arith.constant dense<0.000000e+00> : vector<32x128xf32>
    %2 = tpu.matmul %0, %1, %cst {dimension_numbers = #tpu.dot_dimension_numbers<[1], [1], [0], [0], [0, 0, 1, 0], [], []>} : vector<32x128xbf16>, vector<128x128xbf16>, vector<32x128xf32> -> vector<32x128xf32>
    %c0_3 = arith.constant 0 : index
    %c0_4 = arith.constant 0 : index
    %3 = vector.load %arg4[%c0_3, %c0_4] : memref<1x128xf32, #tpu.memory_space<vmem>>, vector<1x128xf32>
    %4 = vector.broadcast %3 : vector<1x128xf32> to vector<32x128xf32>
    %5 = arith.addf %2, %4 : vector<32x128xf32>
    %cst_5 = arith.constant dense<0xFF800000> : vector<32xf32>
    %6 = vector.multi_reduction <maximumf>, %5, %cst_5 [1] : vector<32x128xf32> to vector<32xf32>
    %7 = vector.shape_cast %6 : vector<32xf32> to vector<32x1xf32>
    %8 = vector.broadcast %7 : vector<32x1xf32> to vector<32x128xf32>
    %9 = arith.subf %5, %8 : vector<32x128xf32>
    %10 = math.exp %9 : vector<32x128xf32>
    %cst_6 = arith.constant dense<0.000000e+00> : vector<32xf32>
    %11 = vector.multi_reduction <add>, %10, %cst_6 [1] : vector<32x128xf32> to vector<32xf32>
    %12 = vector.shape_cast %11 : vector<32xf32> to vector<32x1xf32>
    %13 = tpu.reciprocal %12 {approx = true} : vector<32x1xf32> -> vector<32x1xf32>
    %14 = vector.broadcast %13 : vector<32x1xf32> to vector<32x128xf32>
    %15 = arith.mulf %10, %14 : vector<32x128xf32>
    %16 = arith.truncf %15 : vector<32x128xf32> to vector<32x128xbf16>
    %c0_7 = arith.constant 0 : index
    %c0_8 = arith.constant 0 : index
    %17 = vector.load %arg3[%c0_7, %c0_8] : memref<128x128xbf16, #tpu.memory_space<vmem>>, vector<128x128xbf16>
    %cst_9 = arith.constant dense<0.000000e+00> : vector<32x128xf32>
    %18 = tpu.matmul %16, %17, %cst_9 {dimension_numbers = #tpu.dot_dimension_numbers<[1], [0], [0], [1], [0, 0, 1, 1], [], []>} : vector<32x128xbf16>, vector<128x128xbf16>, vector<32x128xf32> -> vector<32x128xf32>
    %c0_10 = arith.constant 0 : index
    %c0_11 = arith.constant 0 : index
    %19 = vector.load %arg5[%c0_10, %c0_11] : memref<32x128xf32, #tpu.memory_space<vmem>>, vector<32x128xf32>
    tpu.vector_store %arg5[%c0_10, %c0_11], %18 {strides = array<i32>} : memref<32x128xf32, #tpu.memory_space<vmem>>, vector<32x128xf32>,
    return
  }
  func.func @transform_0(%arg0: i32) -> (i32, i32) {
    %c0_i32 = arith.constant 0 : i32
    %c0_i32_0 = arith.constant 0 : i32
    return %arg0, %c0_i32 : i32, i32
  }
  func.func @transform_1(%arg0: i32) -> (i32, i32) {
    %c0_i32 = arith.constant 0 : i32
    %c0_i32_0 = arith.constant 0 : i32
    %c0_i32_1 = arith.constant 0 : i32
    return %c0_i32, %c0_i32_0 : i32, i32
  }
  func.func @transform_2(%arg0: i32) -> (i32, i32) {
    %c0_i32 = arith.constant 0 : i32
    %c0_i32_0 = arith.constant 0 : i32
    %c0_i32_1 = arith.constant 0 : i32
    return %c0_i32, %c0_i32_0 : i32, i32
  }
  func.func @transform_3(%arg0: i32) -> (i32, i32) {
    %c0_i32 = arith.constant 0 : i32
    %c0_i32_0 = arith.constant 0 : i32
    %c0_i32_1 = arith.constant 0 : i32
    return %c0_i32, %c0_i32_0 : i32, i32
  }
  func.func @transform_4(%arg0: i32) -> (i32, i32) {
    %c0_i32 = arith.constant 0 : i32
    %c0_i32_0 = arith.constant 0 : i32
    return %arg0, %c0_i32 : i32, i32
  }
}

</mosaic_0001>

<bundles_post_ra>
// kernel: tpu_custom_call.1
= control target key start
LH: loop header
LB: loop body
LE: loop exit
PB: predicated region body
PF: predicated region fallthrough
CT: control target
= control target key end

     0   :  { %9 = vsyncpa [#allocation3], 0  ;;  %s684_s0 = inlined_call_operand.hbm [shape: bf16[32,128], index: 0, kind: input, shape index: {}]   ;;  %s685_s1 = inlined_call_operand.hbm [shape: bf16[128,128], index: 1, kind: input, shape index: {}]   ;;  %s686_s2 = inlined_call_operand.hbm [shape: bf16[128,128], index: 2, kind: input, shape index: {}]   ;;  %s687_s3 = inlined_call_operand.vmem [shape: f32[1,128], index: 3, kind: input, shape index: {}]   ;;  %s688_s4 = inlined_call_operand.hbm [shape: f32[32,128], index: 4, kind: output, shape index: {}]  }
   0x1   :  { %10 = vsyncpa [#allocation6], 0 }
   0x2   :  { %11 = vsyncpa [#allocation4], 0  ;;  %s584_s15 = smov [#allocation5]   ;;  %s585_s17 = smov [#allocation2]  }
   0x3   :  { %s29_s16 = sshll.u32 %s584_s15, 4  ;;  %s17_s18 = sshll.u32 %s585_s17, 4  ;;  %s30_s16 = int_to_ptr.vmem [resolvable:$true] %s29_s16  ;;  %s617_s18 = int_to_ptr.vmem [resolvable:$true] %s17_s18 }
   0x4   :  { %s490_s21 = scalar_lea.hbm %s685_s1, 1024 }
   0x5   :  { %p491_p0 = scmp.ne.s32.totalorder %s685_s1, %s490_s21  ;;  %p494_p1 = scmp.lt.u32.totalorder %s490_s21, %s685_s1 }
   0x7   :  { %p496_p2 = pnand %p494_p1, %p491_p0 }
   0x9   :  { %499 = shalt.err (!%p496_p2)
}
   0xa   :  { %s500_s26 = scalar_lea.vmem %s30_s16, 1024  ;;  %p505_p4 = scmp.lt.s32.totalorder %s30_s16, %s30_s16 }
   0xb   :  { %p501_p3 = scmp.ne.s32.totalorder %s30_s16, %s500_s26  ;;  %p506_p5 = scmp.lt.s32.totalorder %s500_s26, %s500_s26 }
   0xd   :  { %p507_p6 = por %p506_p5, %p505_p4 }
   0xf   :  { %p508_p7 = pnand %p507_p6, %p501_p3 }
  0x11   :  { %511 = shalt.err (!%p508_p7)
}
  0x12   :  { %s586_s27 = smov 64   ;;  %s587_s28 = smov 4  }
  0x13   :  { %35 = dma.hbm_to_vmem [thread:$0]  %s685_s1, 1024, %s30_s16, [#allocation6], %s586_s27, %s586_s27, %s587_s28  }
  0x14   :  { %s512_s7 = scalar_lea.hbm %s684_s0, 256 }
  0x15   :  { %p513_p8 = scmp.ne.s32.totalorder %s684_s0, %s512_s7  ;;  %p516_p9 = scmp.lt.u32.totalorder %s512_s7, %s684_s0 }
  0x17   :  { %p518_p10 = pnand %p516_p9, %p513_p8 }
  0x19   :  { %521 = shalt.err (!%p518_p10)
}
  0x1a   :  { %s522_s12 = scalar_lea.vmem %s617_s18, 256  ;;  %p527_p12 = scmp.lt.s32.totalorder %s617_s18, %s617_s18 }
  0x1b   :  { %p523_p11 = scmp.ne.s32.totalorder %s617_s18, %s522_s12  ;;  %p528_p13 = scmp.lt.s32.totalorder %s522_s12, %s522_s12 }
  0x1d   :  { %p529_p0 = por %p528_p13, %p527_p12 }
  0x1f   :  { %p530_p1 = pnand %p529_p0, %p523_p11 }
  0x21   :  { %533 = shalt.err (!%p530_p1)
}
  0x22   :  { %23 = dma.hbm_to_vmem [thread:$0]  %s684_s0, 256, %s617_s18, [#allocation3], %s586_s27, %s586_s27, %s587_s28  }
  0x23   :  { %s588_s14 = smov [#allocation7]   ;;  %s534_s19 = scalar_lea.hbm %s686_s2, 1024 }
  0x24   :  { %s41_s15 = sshll.u32 %s588_s14, 4  ;;  %p535_p2 = scmp.ne.s32.totalorder %s686_s2, %s534_s19  ;;  %s42_s15 = int_to_ptr.vmem [resolvable:$true] %s41_s15 }
  0x25   :  { %p538_p3 = scmp.lt.u32.totalorder %s534_s19, %s686_s2 }
  0x27   :  { %p540_p4 = pnand %p538_p3, %p535_p2 }
  0x29   :  { %543 = shalt.err (!%p540_p4)
}
  0x2a   :  { %s544_s24 = scalar_lea.vmem %s42_s15, 1024  ;;  %p549_p6 = scmp.lt.s32.totalorder %s42_s15, %s42_s15 }
  0x2b   :  { %p545_p5 = scmp.ne.s32.totalorder %s42_s15, %s544_s24  ;;  %p550_p7 = scmp.lt.s32.totalorder %s544_s24, %s544_s24 }
  0x2d   :  { %p551_p8 = por %p550_p7, %p549_p6 }
  0x2f   :  { %p552_p9 = pnand %p551_p8, %p545_p5 }
  0x31   :  { %555 = shalt.err (!%p552_p9)
}
  0x32   :  { %47 = dma.hbm_to_vmem [thread:$0]  %s686_s2, 1024, %s42_s15, [#allocation6], %s586_s27, %s586_s27, %s587_s28  }
  0x33   :  { %578 = dma.done.wait [#allocation3], 256  }
  0x34   :  { %579 = vsyncadd [#allocation3], 4294967040 }
  0x35   :  { %580 = dma.done.wait [#allocation6], 2048  }
  0x36   :  { %581 = vsyncadd [#allocation6], 4294965248  ;;  %v456_v0 = vld [vmem:[#allocation5] sm:$0xff]   ;;  %v457_v1 = vld [vmem:[#allocation5 + $0x8] sm:$0xff]  }
  0x37   :  { %408 = vmatprep.subr.bf16.mxu0 %v456_v0  ;;  %v458_v2 = vld [vmem:[#allocation5 + $0x10] sm:$0xff]   ;;  %v459_v4 = vld [vmem:[#allocation5 + $0x18] sm:$0xff]   ;;  %v460_v5 = vld [vmem:[#allocation5 + $0x20] sm:$0xff]  }
  0x38   :  { %409 = vmatpush3.bf16.xpose.msra.mxu0 %v456_v0  ;;  %v464_v3 = vld [vmem:[#allocation2] sm:$0xff]   ;;  %v461_v6 = vld [vmem:[#allocation5 + $0x28] sm:$0xff]   ;;  %v463_v8 = vld [vmem:[#allocation5 + $0x38] sm:$0xff]  }
  0x39   :  { %410 = vmatprep.subr.bf16.mxu0 %v457_v1  ;;  %424 = vmatprep.mubr.bf16.mxu0 %v464_v3  ;;  %v462_v7 = vld [vmem:[#allocation5 + $0x30] sm:$0xff]   ;;  %v465_v9 = vld [vmem:[#allocation2 + $0x8] sm:$0xff]   ;;  %v466_v19 = vld [vmem:[#allocation7] sm:$0xff]  }
  0x3a   :  { %v369_v10 = vld [vmem:[%s687_s3] ss:$0 sm:$0xff]  ;;  %v467_v20 = vld [vmem:[#allocation7 + $0x8] sm:$0xff]   ;;  %428 = vmatprep.subr.bf16.mxu1 %v466_v19  ;;  %v469_v38 = vld [vmem:[#allocation7 + $0x18] sm:$0xff]   ;;  %s589_s3 = smov [#allocation8]  }
  0x3b   :  { %429 = vmatpush3.bf16.msra.mxu1 %v466_v19  ;;  %v468_v21 = vld [vmem:[#allocation7 + $0x10] sm:$0xff]   ;;  %v470_v39 = vld [vmem:[#allocation7 + $0x20] sm:$0xff]   ;;  %v471_v40 = vld [vmem:[#allocation7 + $0x28] sm:$0xff]   ;;  %s356_s26 = sshll.u32 %s589_s3, 4  ;;  %s357_s26 = int_to_ptr.vmem [resolvable:$true] %s356_s26 }
  0x3c   :  { %430 = vmatprep.subr.bf16.mxu1 %v467_v20  ;;  %v472_v41 = vld [vmem:[#allocation7 + $0x30] sm:$0xff]   ;;  %v473_v42 = vld [vmem:[#allocation7 + $0x38] sm:$0xff]   ;;  %s556_s27 = scalar_lea.vmem %s357_s26, 512  ;;  %p561_p11 = scmp.lt.s32.totalorder %s357_s26, %s357_s26 }
  0x3d   :  { %p557_p10 = scmp.ne.s32.totalorder %s357_s26, %s556_s27  ;;  %p562_p12 = scmp.lt.s32.totalorder %s556_s27, %s556_s27 }
  0x3f   :  { %431 = vmatpush3.bf16.msra.mxu1 %v467_v20  ;;  %p563_p13 = por %p562_p12, %p561_p11 }
  0x40   :  { %411 = vmatpush3.bf16.xpose.msra.mxu0 %v457_v1  ;;  %432 = vmatprep.subr.bf16.mxu1 %v468_v21 }
  0x41   :  { %412 = vmatprep.subr.bf16.mxu0 %v458_v2  ;;  %p564_p0 = pnand %p563_p13, %p557_p10 }
  0x43   :  { %433 = vmatpush3.bf16.msra.mxu1 %v468_v21 }
  0x44   :  { %434 = vmatprep.subr.bf16.mxu1 %v469_v38 }
  0x47   :  { %435 = vmatpush3.bf16.msra.mxu1 %v469_v38 }
  0x48   :  { %413 = vmatpush3.bf16.xpose.msra.mxu0 %v458_v2  ;;  %436 = vmatprep.subr.bf16.mxu1 %v470_v39 }
  0x49   :  { %414 = vmatprep.subr.bf16.mxu0 %v459_v4 }
  0x4b   :  { %437 = vmatpush3.bf16.msra.mxu1 %v470_v39 }
  0x4c   :  { %438 = vmatprep.subr.bf16.mxu1 %v471_v40 }
  0x4f   :  { %439 = vmatpush3.bf16.msra.mxu1 %v471_v40 }
  0x50   :  { %415 = vmatpush3.bf16.xpose.msra.mxu0 %v459_v4  ;;  %440 = vmatprep.subr.bf16.mxu1 %v472_v41 }
  0x51   :  { %416 = vmatprep.subr.bf16.mxu0 %v460_v5 }
  0x53   :  { %441 = vmatpush3.bf16.msra.mxu1 %v472_v41 }
  0x54   :  { %442 = vmatprep.subr.bf16.mxu1 %v473_v42 }
  0x57   :  { %443 = vmatpush3.bf16.msra.mxu1 %v473_v42 }
  0x58   :  { %417 = vmatpush3.bf16.xpose.msra.mxu0 %v460_v5 }
  0x59   :  { %418 = vmatprep.subr.bf16.mxu0 %v461_v6 }
  0x60   :  { %419 = vmatpush3.bf16.xpose.msra.mxu0 %v461_v6 }
  0x61   :  { %420 = vmatprep.subr.bf16.mxu0 %v462_v7 }
  0x68   :  { %421 = vmatpush3.bf16.xpose.msra.mxu0 %v462_v7 }
  0x69   :  { %422 = vmatprep.subr.bf16.mxu0 %v463_v8 }
  0x70   :  { %423 = vmatpush3.bf16.xpose.msra.mxu0 %v463_v8 }
  0x77   :  { %425 = vmatmul.mubr.bf16.vlgmr.msra.gmra.mrb[0].mxu0 %v465_v9 }
 0x14a   :  { %v426_v11 = vpop.f32.mrb[0].mxu0 }
 0x14b   :  { %v190_v12 = vadd.f32 %v426_v11, %v369_v10  ;;  %v181_v13 = vpop.f32.mrb[1].mxu0 }
 0x14c   :  { %v182_v14 = vadd.f32 %v369_v10, %v181_v13  ;;  %v427_v15 = vpop.f32.mrb[2].mxu0 }
 0x14d   :  { %200 = vmax.xlane.f32.xlu1 %v190_v12  ;;  %v184_v16 = vpop.f32.mrb[3].mxu0  ;;  %v193_v17 = vadd.f32 %v427_v15, %v369_v10 }
 0x14e   :  { %196 = vmax.xlane.f32.xlu0 %v182_v14  ;;  %v185_v18 = vadd.f32 %v369_v10, %v184_v16 }
 0x151   :  { %202 = vmax.xlane.f32.xlu1 %v193_v17 }
 0x152   :  { %198 = vmax.xlane.f32.xlu0 %v185_v18 }
 0x1da   :  { %v201_v22 = vpop.xlane.xlu1 %200 }
 0x1db   :  { %v206_v23 = vsub.f32 %v190_v12, %v201_v22  ;;  %v197_v24 = vpop.xlane.xlu0 %196 }
 0x1dc   :  { %v204_v25 = vsub.f32 %v182_v14, %v197_v24 }
 0x1dd   :  { %v212_v28 = vmul.f32 1.442695, %v206_v23 }
 0x1de   :  { %v208_v26 = vmul.f32 1.442695, %v204_v25  ;;  %v203_v27 = vpop.xlane.xlu1 %202 }
 0x1df   :  { %v199_v29 = vpop.xlane.xlu0 %198  ;;  %v207_v30 = vsub.f32 %v193_v17, %v203_v27 }
 0x1e0   :  { %474 = vpow2.f32 %v208_v26  ;;  %v205_v31 = vsub.f32 %v185_v18, %v199_v29 }
 0x1e1   :  { %476 = vpow2.f32 %v212_v28  ;;  %v214_v33 = vmul.f32 1.442695, %v207_v30 }
 0x1e2   :  { %v210_v32 = vmul.f32 1.442695, %v205_v31 }
 0x1e4   :  { %478 = vpow2.f32 %v210_v32 }
 0x1e5   :  { %480 = vpow2.f32 %v214_v33 }
 0x1ea   :  { %v475_v34 = vpop.eup %474 }
 0x1eb   :  { %216 = vadd.xlane.f32.xlu0 %v475_v34  ;;  %v477_v35 = vpop.eup %476 }
 0x1ee   :  { %v479_v36 = vpop.eup %478 }
 0x1ef   :  { %220 = vadd.xlane.f32.xlu0 %v477_v35  ;;  %218 = vadd.xlane.f32.xlu1 %v479_v36  ;;  %v481_v37 = vpop.eup %480 }
 0x1f3   :  { %222 = vadd.xlane.f32.xlu1 %v481_v37 }
 0x278   :  { %v217_v43 = vpop.xlane.xlu0 %216 }
 0x279   :  { %482 = vrcp.f32 %v217_v43 }
 0x27c   :  { %v219_v44 = vpop.xlane.xlu1 %218  ;;  %v221_v45 = vpop.xlane.xlu0 %220 }
 0x27d   :  { %484 = vrcp.f32 %v219_v44 }
 0x27e   :  { %486 = vrcp.f32 %v221_v45 }
 0x280   :  { %v223_v46 = vpop.xlane.xlu1 %222 }
 0x281   :  { %488 = vrcp.f32 %v223_v46 }
 0x283   :  { %v483_v47 = vpop.eup %482 }
 0x284   :  { %v228_v49 = vmul.f32 %v483_v47, %v475_v34 }
 0x287   :  { %v485_v48 = vpop.eup %484 }
 0x288   :  { %v229_v50 = vmul.f32 %v485_v48, %v479_v36  ;;  %v487_v51 = vpop.eup %486 }
 0x289   :  { %v230_v54 = vmul.f32 %v487_v51, %v477_v35 }
 0x28a   :  { %v232_v52 = vpack.c.bf16 %v229_v50, %v228_v49 }
 0x28b   :  { %v489_v53 = vpop.eup %488 }
 0x28c   :  { %444 = vmatprep.mubr.bf16.mxu1 %v232_v52  ;;  %v231_v55 = vmul.f32 %v489_v53, %v481_v37 }
 0x28e   :  { %v233_v56 = vpack.c.bf16 %v231_v55, %v230_v54 }
 0x290   :  { %445 = vmatmul.mubr.bf16.vlgmr.msra.gmra.mrb[0].mxu1 %v233_v56 }
 0x363   :  { %v446_v57 = vpop.f32.mrb[0].mxu1 }
 0x364   :  { %349 = vst [vmem:[#allocation8 + $0x10] sm:$0xff] %v446_v57  ;;  %v332_v58 = vpop.f32.mrb[1].mxu1 }
 0x365   :  { %347 = vst [vmem:[#allocation8] sm:$0xff] %v332_v58  ;;  %v447_v59 = vpop.f32.mrb[2].mxu1 }
 0x366   :  { %350 = vst [vmem:[#allocation8 + $0x18] sm:$0xff] %v447_v59  ;;  %v335_v60 = vpop.f32.mrb[3].mxu1 }
 0x367   :  { %348 = vst [vmem:[#allocation8 + $0x8] sm:$0xff] %v335_v60 }
 0x368   :  { %567 = shalt.err (!%p564_p0)
}
 0x369   :  { %s568_s30 = scalar_lea.hbm %s688_s4, 512 }
 0x36a   :  { %p569_p1 = scmp.ne.s32.totalorder %s688_s4, %s568_s30  ;;  %p572_p2 = scmp.lt.u32.totalorder %s568_s30, %s688_s4 }
 0x36c   :  { %p574_p3 = pnand %p572_p2, %p569_p1 }
 0x36e   :  { %577 = shalt.err (!%p574_p3)
}
 0x36f   :  { %s590_s9 = smov 128   ;;  %s591_s10 = smov 8  }
 0x370   :  { %362 = dma.vmem_to_hbm [thread:$0]  %s357_s26, 512, %s688_s4, [#allocation4], %s590_s9, %s590_s9, %s591_s10  }
 0x371   :  { %582 = dma.done.wait [#allocation4], 512  }
 0x372   :  { %583 = vsyncadd [#allocation4], 4294966784 }
 0x373   :  { %366 = vsyncpa [#allocation3], 1 }
 0x374   :  { %367 = vsyncpa [#allocation6], 1 }
 0x375   :  { %368 = vsyncpa [#allocation4], 1 }

</bundles_post_ra>
